<compile_context>
chip_gen: v5e
topology: v5e:2x2
jax: 0.10.0
libtpu: 0.0.40
codegen_flags: <defaults>
</compile_context>

<pallas_src>
import jax
import jax.numpy as jnp
from jax.experimental import pallas as pl
from jax.experimental.pallas import tpu as pltpu

# Finite stand-in for the -inf diagonal mask: forward output is bit-identical
# (softmax weight is exactly 0 either way) but avoids exp(-inf - (-inf)) NaNs.
_NEG_BIG = -1e30


# --------------------------------------------------------------------------
# Kernel 1: k / v projection (1x1 convs == per-pixel matmuls), bf16 on MXU.
# --------------------------------------------------------------------------
def _proj_kernel(x_ref, f_ref, wk_ref, bk_ref, wv_ref, bv_ref, k_out_ref, v_out_ref):
    x = x_ref[0]                                   # (TH, W, C)
    f = f_ref[0]                                   # (TH, W, C)
    TH, W, C = x.shape
    KP = wk_ref.shape[1]

    xf = x.reshape(TH * W, C).astype(jnp.bfloat16)
    ff = f.reshape(TH * W, C).astype(jnp.bfloat16)

    k = jnp.dot(xf, wk_ref[...], preferred_element_type=jnp.float32) + bk_ref[...]
    v = jnp.dot(ff, wv_ref[...], preferred_element_type=jnp.float32) + bv_ref[...]

    k_out_ref[0] = k.reshape(TH, W, KP).astype(jnp.bfloat16)
    v_out_ref[0] = v.reshape(TH, W, C).astype(jnp.bfloat16)


# --------------------------------------------------------------------------
# Kernel 2: criss-cross attention for one (batch, W-tile) of query columns.
#   column path: queries at (h, w) attend over keys (h', w)  -> needs only the
#                tile's k/v columns (kc_ref / vc_ref).
#   row path:    queries at (h, w) attend over keys (h, w')  -> needs the
#                full-width k/v (kf_ref / vf_ref), resident across W-tiles.
# Joint softmax over the H + W key set, fused (no concat, no slicing).
# --------------------------------------------------------------------------
def _cc_attention_kernel(x_ref, kf_ref, vf_ref, kc_ref, vc_ref,
                         wq_ref, bq_ref, gamma_ref, out_ref):
    x = x_ref[0].astype(jnp.float32)               # (H, TW, C)
    H, TW, C = x.shape

    k_row = kf_ref[0]                              # (H, W, KP)  bf16, resident
    v_row = vf_ref[0]                              # (H, W, C)   bf16, resident
    # Per-tile (small) transposes only, in bf16.
    k_col = jnp.transpose(kc_ref[0], (1, 0, 2))    # (TW, H, KP) bf16
    v_col = jnp.transpose(vc_ref[0], (1, 0, 2))    # (TW, H, C)  bf16

    wq = wq_ref[...]                               # (C, KP) bf16
    bq = bq_ref[...]                               # (1, KP) f32
    gamma = gamma_ref[0, 0]                        # scalar (SMEM)
    KP = wq.shape[1]

    # ---- q projection for this tile (bf16 MXU, f32 accumulate + bias) ----
    q = jnp.dot(x.reshape(H * TW, C).astype(jnp.bfloat16), wq,
                preferred_element_type=jnp.float32) + bq
    q_row = q.reshape(H, TW, KP).astype(jnp.bfloat16)   # (H, TW, KP)
    q_col = jnp.transpose(q_row, (1, 0, 2))              # (TW, H, KP)

    # ---- column-attention logits (TW, H, H'), additive diag mask ----
    e_h = jnp.einsum('thc,tgc->thg', q_col, k_col,
                     preferred_element_type=jnp.float32)          # (TW, H, H)
    rows = jax.lax.broadcasted_iota(jnp.int32, (H, H), 0)
    cols = jax.lax.broadcasted_iota(jnp.int32, (H, H), 1)
    diag_mask = jnp.where(rows == cols, _NEG_BIG, 0.0).astype(jnp.float32)
    e_h = e_h + diag_mask[None, :, :]

    # ---- row-attention logits (H, TW, W') ----
    e_w = jnp.einsum('htc,hwc->htw', q_row, k_row,
                     preferred_element_type=jnp.float32)          # (H, TW, W)

    # ---- fused joint softmax over the (H + W) key set (all f32) ----
    m_h = jnp.transpose(jnp.max(e_h, axis=2))      # (H, TW)
    m_w = jnp.max(e_w, axis=2)                     # (H, TW)
    m = jnp.maximum(m_h, m_w)                      # joint per-pixel max
    m_col = jnp.transpose(m)                       # (TW, H)

    p_h = jnp.exp(e_h - m_col[:, :, None])         # (TW, H, H) f32, unnormalized
    p_w = jnp.exp(e_w - m[:, :, None])             # (H, TW, W) f32, unnormalized
    denom = jnp.transpose(jnp.sum(p_h, axis=2)) + jnp.sum(p_w, axis=2)   # (H, TW) f32

    # ---- attend: bf16 operands into the MXU, f32 accumulation ----
    out_h = jnp.einsum('thg,tgc->thc', p_h.astype(jnp.bfloat16), v_col,
                       preferred_element_type=jnp.float32)        # (TW, H, C)
    out_h = jnp.transpose(out_h, (1, 0, 2))                       # (H, TW, C)
    out_w = jnp.einsum('htw,hwc->htc', p_w.astype(jnp.bfloat16), v_row,
                       preferred_element_type=jnp.float32)        # (H, TW, C)

    # gamma folded into the per-pixel 1/denom scale; reciprocal on the EUP.
    scale = gamma * pl.reciprocal(denom, approx=True)             # (H, TW)
    out = (out_h + out_w) * scale[:, :, None] + x
    out_ref[0] = out.astype(out_ref.dtype)


# --------------------------------------------------------------------------
# Wrappers
# --------------------------------------------------------------------------
def criss_cross_attention_nhwc(x, f, params, *, tile_h=None, tile_w=None):
    """Core entry point: x, f are NHWC (B, H, W, C)."""
    wq, bq, wk, bk, wv, bv, gamma = params
    B, H, W, C = x.shape
    C8 = wq.shape[1]
    KP = ((C8 + 127) // 128) * 128                 # pad q/k channels to 128-lane slabs

    # Tile sizes (toy defaults; for CCNet shapes use e.g. tile_w=32 on v7x /
    # 64 on v5e/v6e so the resident k/v + tiles fit VMEM).
    if tile_h is None:
        tile_h = 8 if H % 8 == 0 else H
    if tile_w is None:
        tile_w = 8 if W % 8 == 0 else W
    assert H % tile_h == 0 and W % tile_w == 0

    def pad_cols(a, kp):
        return a if a.shape[1] == kp else jnp.pad(a, ((0, 0), (0, kp - a.shape[1])))

    # Weights cast once (bf16 MXU operands; biases stay f32, added post-acc).
    wq_p = pad_cols(wq, KP).astype(jnp.bfloat16)   # (C, KP)
    bq_p = pad_cols(bq, KP).astype(jnp.float32)    # (1, KP)
    wk_p = pad_cols(wk, KP).astype(jnp.bfloat16)   # (C, KP)
    bk_p = pad_cols(bk, KP).astype(jnp.float32)    # (1, KP)
    wv_b = wv.astype(jnp.bfloat16)                 # (C, C)
    bv_f = bv.astype(jnp.float32)                  # (1, C)
    gamma_f = gamma.astype(jnp.float32)            # (1, 1) -> SMEM

    vmem = pl.BlockSpec(memory_space=pltpu.MemorySpace.VMEM)
    smem = pl.BlockSpec(memory_space=pltpu.MemorySpace.SMEM)

    # ---- pass 1: k / v projections over the full image (row-tiled) ----
    k_pad, v_bf = pl.pallas_call(
        _proj_kernel,
        out_shape=(jax.ShapeDtypeStruct((B, H, W, KP), jnp.bfloat16),
                   jax.ShapeDtypeStruct((B, H, W, C), jnp.bfloat16)),
        grid=(B, H // tile_h),
        in_specs=[
            pl.BlockSpec((1, tile_h, W, C), lambda b, hi: (b, hi, 0, 0)),   # x
            pl.BlockSpec((1, tile_h, W, C), lambda b, hi: (b, hi, 0, 0)),   # F
            vmem, vmem, vmem, vmem,                                         # wk, bk, wv, bv
        ],
        out_specs=(
            pl.BlockSpec((1, tile_h, W, KP), lambda b, hi: (b, hi, 0, 0)),
            pl.BlockSpec((1, tile_h, W, C), lambda b, hi: (b, hi, 0, 0)),
        ),
        compiler_params=pltpu.CompilerParams(
            dimension_semantics=("parallel", "parallel")),
    )(x, f, wk_p, bk_p, wv_b, bv_f)

    # ---- pass 2: criss-cross attention, tiled over query columns ----
    out = pl.pallas_call(
        _cc_attention_kernel,
        out_shape=jax.ShapeDtypeStruct((B, H, W, C), x.dtype),
        grid=(B, W // tile_w),
        in_specs=[
            pl.BlockSpec((1, H, tile_w, C), lambda b, wi: (b, 0, wi, 0)),    # x tile (q + residual)
            pl.BlockSpec((1, H, W, KP), lambda b, wi: (b, 0, 0, 0)),         # k full-width (row path)
            pl.BlockSpec((1, H, W, C), lambda b, wi: (b, 0, 0, 0)),          # v full-width (row path)
            pl.BlockSpec((1, H, tile_w, KP), lambda b, wi: (b, 0, wi, 0)),   # k tile cols (column path)
            pl.BlockSpec((1, H, tile_w, C), lambda b, wi: (b, 0, wi, 0)),    # v tile cols (column path)
            vmem,                                                            # wq (C, KP) bf16
            vmem,                                                            # bq (1, KP) f32
            smem,                                                            # gamma (1, 1)
        ],
        out_specs=pl.BlockSpec((1, H, tile_w, C), lambda b, wi: (b, 0, wi, 0)),
        compiler_params=pltpu.CompilerParams(
            # Both axes fully independent -> megacore can shard either one
            # (keeps v7x's second TC busy even at batch 1).
            dimension_semantics=("parallel", "parallel")),
    )(x, k_pad, v_bf, k_pad, v_bf, wq_p, bq_p, gamma_f)

    return out


def criss_cross_attention(x_nchw, f_nchw, params):
    """PyTorch-compatible NCHW wrapper: x_nchw, f_nchw are (B, C, H, W)."""
    x = jnp.transpose(x_nchw, (0, 2, 3, 1))        # NHWC
    f = jnp.transpose(f_nchw, (0, 2, 3, 1))        # NHWC
    out = criss_cross_attention_nhwc(x, f, params)
    return jnp.transpose(out, (0, 3, 1, 2))        # back to NCHW


def reference(x_nchw, f_nchw, params):
    """Pure-JAX f32 reference of the PyTorch forward (for correctness check)."""
    wq, bq, wk, bk, wv, bv, gamma = params
    B, C, H, W = x_nchw.shape
    x = jnp.transpose(x_nchw, (0, 2, 3, 1)).astype(jnp.float32)
    f = jnp.transpose(f_nchw, (0, 2, 3, 1)).astype(jnp.float32)
    q = jnp.einsum('bhwc,cd->bhwd', x, wq) + bq[0]
    k = jnp.einsum('bhwc,cd->bhwd', x, wk) + bk[0]
    v = jnp.einsum('bhwc,cd->bhwd', f, wv) + bv[0]
    e_h = jnp.einsum('bhwc,bgwc->bhwg', q, k)
    diag = (jnp.arange(H)[:, None] == jnp.arange(H)[None, :])[:, None, :]
    e_h = jnp.where(diag[None], -jnp.inf, e_h)
    e_w = jnp.einsum('bhwc,bhgc->bhwg', q, k)
    att = jax.nn.softmax(jnp.concatenate([e_h, e_w], axis=3), axis=3)
    att_h, att_w = att[..., :H], att[..., H:]
    out_h = jnp.einsum('bhwg,bgwc->bhwc', att_h, v)
    out_w = jnp.einsum('bhwg,bhgc->bhwc', att_w, v)
    out = gamma[0, 0] * (out_h + out_w) + x
    return jnp.transpose(out, (0, 3, 1, 2))


if __name__ == "__main__":
    B, C, H, W = 2, 32, 16, 16            # in_dim = 32 -> in_dim // 8 = 4
    C8 = C // 8

    key = jax.random.PRNGKey(0)
    kx, kf, k1, k2, k3, k4, k5, k6 = jax.random.split(key, 8)

    x = jax.random.normal(kx, (B, C, H, W), dtype=jnp.float32)
    f = jax.random.normal(kf, (B, C, H, W), dtype=jnp.float32)

    # Deterministic synthetic parameters (1x1 conv weights stored as (Cin, Cout)).
    wq = 0.1 * jax.random.normal(k1, (C, C8), dtype=jnp.float32)
    bq = 0.1 * jax.random.normal(k2, (1, C8), dtype=jnp.float32)
    wk = 0.1 * jax.random.normal(k3, (C, C8), dtype=jnp.float32)
    bk = 0.1 * jax.random.normal(k4, (1, C8), dtype=jnp.float32)
    wv = 0.1 * jax.random.normal(k5, (C, C), dtype=jnp.float32)
    bv = 0.1 * jax.random.normal(k6, (1, C), dtype=jnp.float32)
    # Module inits gamma to 0; use a nonzero value so the attention path is
    # actually exercised in the output.
    gamma = jnp.full((1, 1), 0.5, dtype=jnp.float32)

    params = (wq, bq, wk, bk, wv, bv, gamma)

    out = criss_cross_attention(x, f, params)
    out = jax.block_until_ready(out)

    ref = reference(x, f, params)
    assert out.shape == (B, C, H, W)
    # Tolerance loosened for bf16 MXU operands (f32 accumulation, f32 softmax).
    assert jnp.allclose(out, ref, rtol=5e-2, atol=5e-2), \
        f"max abs diff = {jnp.max(jnp.abs(out - ref))}"

    print("KERNEL_OK")
</pallas_src>

<mosaic_0001>
module attributes {stable_mosaic.version = 11 : i64} {
  func.func @_proj_kernel(%arg0: i32, %arg1: i32, %arg2: memref<1x8x16x32xf32, #tpu.memory_space<vmem>>, %arg3: memref<1x8x16x32xf32, #tpu.memory_space<vmem>>, %arg4: memref<32x128xbf16, #tpu.memory_space<vmem>>, %arg5: memref<1x128xf32, #tpu.memory_space<vmem>>, %arg6: memref<32x32xbf16, #tpu.memory_space<vmem>>, %arg7: memref<1x32xf32, #tpu.memory_space<vmem>>, %arg8: memref<1x8x16x128xbf16, #tpu.memory_space<vmem>>, %arg9: memref<1x8x16x32xbf16, #tpu.memory_space<vmem>>) attributes {dimension_semantics = [#tpu.dimension_semantics<parallel>, #tpu.dimension_semantics<parallel>], iteration_bounds = array<i64: 2, 2>, scalar_prefetch = 0 : i64, scratch_operands = 0 : i64, tpu.core_type = #tpu.core_type<tc>, window_params = [{transform_indices = @transform_0, window_bounds = array<i64: 1, 8, 16, 32>}, {transform_indices = @transform_1, window_bounds = array<i64: 1, 8, 16, 32>}, {pipeline_mode = #tpu.pipeline_mode<synchronous>, transform_indices = @transform_2, window_bounds = array<i64: 32, 128>}, {pipeline_mode = #tpu.pipeline_mode<synchronous>, transform_indices = @transform_3, window_bounds = array<i64: 1, 128>}, {pipeline_mode = #tpu.pipeline_mode<synchronous>, transform_indices = @transform_4, window_bounds = array<i64: 32, 32>}, {pipeline_mode = #tpu.pipeline_mode<synchronous>, transform_indices = @transform_5, window_bounds = array<i64: 1, 32>}, {transform_indices = @transform_6, window_bounds = array<i64: 1, 8, 16, 128>}, {transform_indices = @transform_7, window_bounds = array<i64: 1, 8, 16, 32>}]} {
    %c0 = arith.constant 0 : index
    %c0_0 = arith.constant 0 : index
    %c0_1 = arith.constant 0 : index
    %c0_2 = arith.constant 0 : index
    %0 = vector.load %arg2[%c0, %c0_0, %c0_1, %c0_2] : memref<1x8x16x32xf32, #tpu.memory_space<vmem>>, vector<1x8x16x32xf32>
    %1 = vector.shape_cast %0 : vector<1x8x16x32xf32> to vector<8x16x32xf32>
    %c0_3 = arith.constant 0 : index
    %c0_4 = arith.constant 0 : index
    %c0_5 = arith.constant 0 : index
    %c0_6 = arith.constant 0 : index
    %2 = vector.load %arg3[%c0_3, %c0_4, %c0_5, %c0_6] : memref<1x8x16x32xf32, #tpu.memory_space<vmem>>, vector<1x8x16x32xf32>
    %3 = vector.shape_cast %2 : vector<1x8x16x32xf32> to vector<8x16x32xf32>
    %4 = vector.shape_cast %1 : vector<8x16x32xf32> to vector<128x32xf32>
    %5 = arith.truncf %4 : vector<128x32xf32> to vector<128x32xbf16>
    %6 = vector.shape_cast %3 : vector<8x16x32xf32> to vector<128x32xf32>
    %7 = arith.truncf %6 : vector<128x32xf32> to vector<128x32xbf16>
    %c0_7 = arith.constant 0 : index
    %c0_8 = arith.constant 0 : index
    %8 = vector.load %arg4[%c0_7, %c0_8] : memref<32x128xbf16, #tpu.memory_space<vmem>>, vector<32x128xbf16>
    %cst = arith.constant dense<0.000000e+00> : vector<128x128xf32>
    %9 = tpu.matmul %5, %8, %cst {dimension_numbers = #tpu.dot_dimension_numbers<[1], [0], [0], [1], [0, 0, 1, 1], [], []>} : vector<128x32xbf16>, vector<32x128xbf16>, vector<128x128xf32> -> vector<128x128xf32>
    %c0_9 = arith.constant 0 : index
    %c0_10 = arith.constant 0 : index
    %10 = vector.load %arg5[%c0_9, %c0_10] : memref<1x128xf32, #tpu.memory_space<vmem>>, vector<1x128xf32>
    %11 = vector.broadcast %10 : vector<1x128xf32> to vector<128x128xf32>
    %12 = arith.addf %9, %11 : vector<128x128xf32>
    %c0_11 = arith.constant 0 : index
    %c0_12 = arith.constant 0 : index
    %13 = vector.load %arg6[%c0_11, %c0_12] : memref<32x32xbf16, #tpu.memory_space<vmem>>, vector<32x32xbf16>
    %cst_13 = arith.constant dense<0.000000e+00> : vector<128x32xf32>
    %14 = tpu.matmul %7, %13, %cst_13 {dimension_numbers = #tpu.dot_dimension_numbers<[1], [0], [0], [1], [0, 0, 1, 1], [], []>} : vector<128x32xbf16>, vector<32x32xbf16>, vector<128x32xf32> -> vector<128x32xf32>
    %c0_14 = arith.constant 0 : index
    %c0_15 = arith.constant 0 : index
    %15 = vector.load %arg7[%c0_14, %c0_15] : memref<1x32xf32, #tpu.memory_space<vmem>>, vector<1x32xf32>
    %16 = vector.broadcast %15 : vector<1x32xf32> to vector<128x32xf32>
    %17 = arith.addf %14, %16 : vector<128x32xf32>
    %18 = vector.shape_cast %12 : vector<128x128xf32> to vector<8x16x128xf32>
    %19 = arith.truncf %18 : vector<8x16x128xf32> to vector<8x16x128xbf16>
    %c0_16 = arith.constant 0 : index
    %c0_17 = arith.constant 0 : index
    %c0_18 = arith.constant 0 : index
    %c0_19 = arith.constant 0 : index
    %20 = vector.load %arg8[%c0_16, %c0_17, %c0_18, %c0_19] : memref<1x8x16x128xbf16, #tpu.memory_space<vmem>>, vector<1x8x16x128xbf16>
    %21 = vector.shape_cast %20 : vector<1x8x16x128xbf16> to vector<8x16x128xbf16>
    %22 = vector.shape_cast %19 : vector<8x16x128xbf16> to vector<1x8x16x128xbf16>
    tpu.vector_store %arg8[%c0_16, %c0_17, %c0_18, %c0_19], %22 {strides = array<i32>} : memref<1x8x16x128xbf16, #tpu.memory_space<vmem>>, vector<1x8x16x128xbf16>,
    %23 = vector.shape_cast %17 : vector<128x32xf32> to vector<8x16x32xf32>
    %24 = arith.truncf %23 : vector<8x16x32xf32> to vector<8x16x32xbf16>
    %c0_20 = arith.constant 0 : index
    %c0_21 = arith.constant 0 : index
    %c0_22 = arith.constant 0 : index
    %c0_23 = arith.constant 0 : index
    %25 = vector.load %arg9[%c0_20, %c0_21, %c0_22, %c0_23] : memref<1x8x16x32xbf16, #tpu.memory_space<vmem>>, vector<1x8x16x32xbf16>
    %26 = vector.shape_cast %25 : vector<1x8x16x32xbf16> to vector<8x16x32xbf16>
    %27 = vector.shape_cast %24 : vector<8x16x32xbf16> to vector<1x8x16x32xbf16>
    tpu.vector_store %arg9[%c0_20, %c0_21, %c0_22, %c0_23], %27 {strides = array<i32>} : memref<1x8x16x32xbf16, #tpu.memory_space<vmem>>, vector<1x8x16x32xbf16>,
    return
  }
  func.func @transform_0(%arg0: i32, %arg1: i32) -> (i32, i32, i32, i32) {
    %c0_i32 = arith.constant 0 : i32
    %c0_i32_0 = arith.constant 0 : i32
    %c0_i32_1 = arith.constant 0 : i32
    return %arg0, %arg1, %c0_i32, %c0_i32_0 : i32, i32, i32, i32
  }
  func.func @transform_1(%arg0: i32, %arg1: i32) -> (i32, i32, i32, i32) {
    %c0_i32 = arith.constant 0 : i32
    %c0_i32_0 = arith.constant 0 : i32
    %c0_i32_1 = arith.constant 0 : i32
    return %arg0, %arg1, %c0_i32, %c0_i32_0 : i32, i32, i32, i32
  }
  func.func @transform_2(%arg0: i32, %arg1: i32) -> (i32, i32) {
    %c0_i32 = arith.constant 0 : i32
    %c0_i32_0 = arith.constant 0 : i32
    %c0_i32_1 = arith.constant 0 : i32
    return %c0_i32, %c0_i32_0 : i32, i32
  }
  func.func @transform_3(%arg0: i32, %arg1: i32) -> (i32, i32) {
    %c0_i32 = arith.constant 0 : i32
    %c0_i32_0 = arith.constant 0 : i32
    %c0_i32_1 = arith.constant 0 : i32
    return %c0_i32, %c0_i32_0 : i32, i32
  }
  func.func @transform_4(%arg0: i32, %arg1: i32) -> (i32, i32) {
    %c0_i32 = arith.constant 0 : i32
    %c0_i32_0 = arith.constant 0 : i32
    %c0_i32_1 = arith.constant 0 : i32
    return %c0_i32, %c0_i32_0 : i32, i32
  }
  func.func @transform_5(%arg0: i32, %arg1: i32) -> (i32, i32) {
    %c0_i32 = arith.constant 0 : i32
    %c0_i32_0 = arith.constant 0 : i32
    %c0_i32_1 = arith.constant 0 : i32
    return %c0_i32, %c0_i32_0 : i32, i32
  }
  func.func @transform_6(%arg0: i32, %arg1: i32) -> (i32, i32, i32, i32) {
    %c0_i32 = arith.constant 0 : i32
    %c0_i32_0 = arith.constant 0 : i32
    %c0_i32_1 = arith.constant 0 : i32
    return %arg0, %arg1, %c0_i32, %c0_i32_0 : i32, i32, i32, i32
  }
  func.func @transform_7(%arg0: i32, %arg1: i32) -> (i32, i32, i32, i32) {
    %c0_i32 = arith.constant 0 : i32
    %c0_i32_0 = arith.constant 0 : i32
    %c0_i32_1 = arith.constant 0 : i32
    return %arg0, %arg1, %c0_i32, %c0_i32_0 : i32, i32, i32, i32
  }
}

</mosaic_0001>

<bundles_post_ra>
// kernel: tpu_custom_call.1
= control target key start
LH: loop header
LB: loop body
LE: loop exit
PB: predicated region body
PF: predicated region fallthrough
CT: control target
= control target key end

     0   :  { %s1844_s0 = inlined_call_operand.hbm [shape: f32[2,16,16,32], index: 0, kind: input, shape index: {}]   ;;  %s1845_s1 = inlined_call_operand.hbm [shape: f32[2,16,16,32], index: 1, kind: input, shape index: {}]   ;;  %s1846_s2 = inlined_call_operand.hbm [shape: bf16[32,128], index: 2, kind: input, shape index: {}]   ;;  %s1847_s3 = inlined_call_operand.vmem [shape: f32[1,128], index: 3, kind: input, shape index: {}]   ;;  %s1848_s4 = inlined_call_operand.hbm [shape: bf16[32,32], index: 4, kind: input, shape index: {}]   ;;  %s1849_s5 = inlined_call_operand.vmem [shape: f32[1,32], index: 5, kind: input, shape index: {}]   ;;  %s1850_s6 = inlined_call_operand.hbm [shape: bf16[2,16,16,128], index: 6, kind: output, shape index: {0}]   ;;  %s1851_s7 = inlined_call_operand.hbm [shape: bf16[2,16,16,32], index: 7, kind: output, shape index: {1}]  }
   0x1   :  { %1860 = sst [smem:[#allocation25_spill]] %s1844_s0 }
   0x2   :  { %1861 = sst [smem:[#allocation26_spill]] %s1846_s2 }
   0x3   :  { %1862 = sst [smem:[#allocation27_spill]] %s1848_s4 }
   0x4   :  { %1863 = sst [smem:[#allocation28_spill]] %s1850_s6 }
   0x5   :  { %1864 = sst [smem:[#allocation29_spill]] %s1851_s7 }
   0x6   :  { %13 = vsyncpa [#allocation3], 0 }
   0x7   :  { %15 = vsyncpa [#allocation3 + $0x1], 0 }
   0x8   :  { %16 = vsyncpa [#allocation6], 0 }
   0x9   :  { %18 = vsyncpa [#allocation6 + $0x1], 0 }
   0xa   :  { %19 = vsyncpa [#allocation9], 0 }
   0xb   :  { %20 = vsyncpa [#allocation4], 0 }
   0xc   :  { %22 = vsyncpa [#allocation4 + $0x1], 0 }
   0xd   :  { %23 = vsyncpa [#allocation12], 0 }
   0xe   :  { %25 = vsyncpa [#allocation12 + $0x1], 0  ;;  %s1486_s24 = smov 0   ;;  %s1488_s25 = smov 0  }
   0xf   :  { %s1490_s26 = smov 0   ;;  %s1492_s27 = smov 0  }
  0x10   :  { %s1494_s28 = smov 0   ;;  %s1496_s29 = smov 0  }
  0x11   :  { %s1498_s30 = smov 0   ;;  %s1500_s8 = smov 0  }
  0x12 LB: > { %1865 = sst [smem:[#allocation19_spill]] %s1408_s24  ;;  %s1527_s9 = sadd.s32 4294967295, %s1436_s8   ;;  %s1436_s8 = sphi %s1500_s8, %s31_s8   ;;  %s1432_s30 = sphi %s1498_s30, %s1895_s30   ;;  %s1428_s29 = sphi %s1496_s29, %s1894_s29   ;;  %s1424_s28 = sphi %s1494_s28, %s1893_s28   ;;  %s1420_s27 = sphi %s1492_s27, %s1892_s27   ;;  %s1416_s26 = sphi %s1490_s26, %s1891_s26   ;;  %s1412_s25 = sphi %s1488_s25, %s1890_s25   ;;  %s1408_s24 = sphi %s1486_s24, %s1889_s24  }
  0x13   : > { %1866 = sst [smem:[#allocation20_spill]] %s1424_s28  ;;  %s932_s10 = sadd.s32 4294967294, %s1436_s8  }
  0x14   : > { %p65_p0 = scmp.ne.s32.totalorder %s1412_s25, %s1408_s24  ;;  %p66_p1 = scmp.eq.s32.totalorder %s1527_s9, 0 }
  0x15   : > { %p203_p2 = scmp.eq.s32.totalorder %s1527_s9, 3  ;;  %p209_p3 = scmp.eq.s32.totalorder %s932_s10, 3 }
  0x16   : > { %p1536_p4 = por %p66_p1, %p65_p0  ;;  %p933_p5 = scmp.ge.s32.totalorder %s1436_s8, 1 }
  0x17   : > { %p1541_p6 = por %p209_p3, %p65_p0  ;;  %p244_p7 = scmp.lt.s32.totalorder %s1436_s8, 5 }
  0x18   : > { %s1870_s2 = sld [smem:[#allocation26_spill]]  ;;  %s1438_s17 = smov [#allocation7]  }
  0x19   : > { %s1868_s12 = scalar_select %p1541_p6, 1, 0 }
  0x1a   : > { %p1549_p8 = pnand %p933_p5, %p244_p7  ;;  %s257_s18 = sshll.u32 %s1438_s17, 4  ;;  %s258_s18 = int_to_ptr.vmem [resolvable:$true] %s257_s18 }
  0x1b   : > { %1869 = sst [smem:[#allocation21_spill]] %s1868_s12  ;;  %s1439_s22 = smov 64  }
  0x1c   : > { %p1073_p9 = pneg %p1549_p8  ;;  %s1872_s4 = sld [smem:[#allocation27_spill]] }
  0x1d   : > { %s1440_s23 = smov 4   ;;  %s1441_s10 = smov [#allocation8]  }
  0x1e   : > { %s255_s15 = sshll.u32 %s1870_s2, 4  ;;  %p1074_p10 = pnand %p1073_p9, %p66_p1  ;;  %s256_s15 = int_to_ptr.hbm [resolvable:$true] %s255_s15 }
  0x1f   : > { %s274_s13 = sshll.u32 %s1441_s10, 4  ;;  %s40_s14 = sadd.s32 1, %s1428_s29  ;;  %s275_s13 = int_to_ptr.vmem [resolvable:$true] %s274_s13 }
  0x20   : > { %1076 = dma.hbm_to_vmem [thread:$0]  (!%p1074_p10), %s256_s15, 256, %s258_s18, [#allocation6], %s1439_s22, %s1439_s22, %s1440_s23  }
  0x21   : > { %s43_s17 = sadd.s32 1, %s1432_s30  ;;  %p41_p11 = scmp.ge.s32.totalorder %s40_s14, 2 }
  0x22   : > { %s272_s21 = sshll.u32 %s1872_s4, 4  ;;  %s52_s19 = sadd.s32 1, %s1416_s26  ;;  %s273_s21 = int_to_ptr.hbm [resolvable:$true] %s272_s21 }
  0x23   : > { %1079 = dma.hbm_to_vmem [thread:$0]  (!%p1074_p10), %s273_s21, 256, %s275_s13, [#allocation9], %s1439_s22, %s1439_s22, %s1440_s23  }
  0x24   : > { %p59_p12 = scmp.ne.s32.totalorder %s1416_s26, %s1412_s25  ;;  %p60_p13 = scmp.eq.s32.totalorder %s1436_s8, 0 }
  0x25   : > { %s1897_s14 = smov (%p41_p11, %s40_s14), 0  ;;  %s1899_s17 = smov (!%p41_p11, %s43_s17), %s1432_s30 }
  0x26   : > { %1873 = sst [smem:[#allocation22_spill]] %s1897_s14  ;;  %s48_s15 = ssub.s32 %s1428_s29, %s1897_s14 }
  0x27   : > { %p1571_p0 = por %p60_p13, %p59_p12  ;;  %p45_p3 = scmp.ge.s32.totalorder %s1899_s17, 2 }
  0x28   : > { %p1577_p5 = por %p203_p2, %p59_p12  ;;  %p1096_p7 = scmp.lt.s32.totalorder %s1436_s8, 4 }
  0x29   : > { %s291_s21 = sand.u32 1, %s1416_s26   ;;  %s1901_s17 = smov (%p45_p3, %s1899_s17), 0 }
  0x2a   : > { %s1875_s20 = scalar_select %p1577_p5, 1, 0 }
  0x2b   : > { %1877 = sst [smem:[#allocation24_spill]] %s1901_s17  ;;  %s937_s22 = sshll.u32 %s291_s21, 7 }
  0x2c   : > { %1876 = sst [smem:[#allocation23_spill]] %s1875_s20  ;;  %s47_s23 = ssub.s32 %s1432_s30, %s1901_s17 }
  0x2d   : > { %s49_s10 = sor.u32 %s48_s15, %s47_s23  ;;  %s998_s13 = sshll.u32 %s1428_s29, 4 }
  0x2e   : > { %p50_p9 = scmp.eq.s32.totalorder %s49_s10, 0  ;;  %s940_s2 = sshll.u32 %s1432_s30, 5 }
  0x2f   : > { %s301_s4 = sadd.s32 %s998_s13, %s940_s2  ;;  %s295_s14 = scalar_lea.vmem [#allocation2], %s937_s22 }
  0x30   : > { %s306_s12 = sshll.u32 %s295_s14, 4  ;;  %s941_s7 = sshll.u32 %s301_s4, 3  ;;  %s307_s12 = int_to_ptr.vmem [resolvable:$true] %s306_s12 }
  0x31   : > { %s1590_s24 = scalar_select %p50_p9, %s1416_s26, %s52_s19  }
  0x32   : > { %s1878_s0 = sld [smem:[#allocation25_spill]]  ;;  %p1599_p2 = pnand %p1096_p7, %p1571_p0 }
  0x33   : > { %s292_s14 = scalar_lea.sflag [#allocation3], %s291_s21  ;;  %s1442_s19 = smov 128  }
  0x34   : > { %s1443_s15 = smov 8   ;;  %s328_s6 = scalar_lea.hbm %s1845_s1, %s941_s7 }
  0x35   : > { %s320_s20 = scalar_lea.vmem [#allocation5], %s937_s22  ;;  %s329_s10 = sshll.u32 %s328_s6, 4  ;;  %s330_s10 = int_to_ptr.hbm [resolvable:$true] %s329_s10 }
  0x36   : > { %s331_s18 = sshll.u32 %s320_s20, 4  ;;  %s316_s13 = sand.u32 1, %s1436_s8   ;;  %s332_s18 = int_to_ptr.vmem [resolvable:$true] %s331_s18 }
  0x37   : > { %343 = sbr.rel (%p1549_p8) target bundleno = 287 (0x11f), region = 44 }
  0x38   : > { %s303_s28 = scalar_lea.hbm %s1878_s0, %s941_s7  ;;  %s317_s0 = scalar_lea.sflag [#allocation6], %s316_s13 }
  0x39   : > { %s304_s2 = sshll.u32 %s303_s28, 4  ;;  %s1614_s28 = sand.u32 (!%p1549_p8), 1, %s1412_s25   ;;  %s305_s2 = int_to_ptr.hbm [resolvable:$true] %s304_s2 }
  0x3a   : > { %1083 = dma.hbm_to_vmem [thread:$0]  (!%p1599_p2), %s305_s2, 2048, %s307_s12, %s292_s14, %s1442_s19, %s1442_s19, %s1443_s15  }
  0x3b   : > { %1086 = dma.hbm_to_vmem [thread:$0]  (!%p1599_p2), %s330_s10, 2048, %s332_s18, %s317_s0, %s1442_s19, %s1442_s19, %s1443_s15  }
  0x3c   : > { %s948_s12 = sshll.u32 %s1614_s28, 7  ;;  %s346_s7 = scalar_lea.sflag [#allocation3], %s1614_s28 }
  0x3d   : > { %s1618_s21 = scalar_lea.vmem [#allocation2], %s948_s12 }
  0x3e   : > { %1383 = dma.done.wait (%p1536_p4), %s346_s7, 2048  }
  0x3f   : > { %1385 = vsyncadd (%p1536_p4), %s346_s7, 4294965248  ;;  %s355_s0 = sand.u32 1, %s1527_s9   ;;  %s1625_s17 = scalar_lea.vmem [#allocation5], %s948_s12 }
  0x40   : > { %s356_s16 = scalar_lea.sflag [#allocation6], %s355_s0 }
  0x41   : > { %1387 = dma.done.wait (%p1536_p4), %s356_s16, 2048  }
  0x42   : > { %1389 = vsyncadd (%p1536_p4), %s356_s16, 4294965248 }
  0x43   : > { %1391 = dma.done.wait (%p66_p1), [#allocation6], 256  }
  0x44   : > { %1393 = vsyncadd (%p66_p1), [#allocation6], 4294967040 }
  0x45   : > { %1395 = dma.done.wait (%p66_p1), [#allocation9], 256  }
  0x46   : > { %1397 = vsyncadd (%p66_p1), [#allocation9], 4294967040  ;;  %v1001_v0 = vld [vmem:[#allocation7 + $0x8] sm:$0xff]  ;;  %v1003_v1 = vld [vmem:[#allocation8 + $0x8] sm:$0xff]  ;;  %vm484_vm0 = vcmask 261120   ;;  %s952_s22 = sshll.u32 %s1614_s28, 6 }
  0x47   : > { %v1000_v2 = vld [vmem:[#allocation7] sm:$0xff]  ;;  %v1002_v3 = vld [vmem:[#allocation8] sm:$0xff]  ;;  %v417_v5 = vld [vmem:[%s1618_s21 + $0x8] sm:$0xff]  ;;  %515 = vmatpush.bf16.msra.mxu0 %v1001_v0  ;;  %1053 = vmatpush.bf16.msra.mxu2 %v1001_v0  ;;  %vm699_vm1 = vcmask 257024   ;;  %s1699_s19 = scalar_lea.vmem [#allocation11], %s952_s22  ;;  %s1709_s15 = scalar_lea.vmem [#allocation10], %s952_s22 }
  0x48   : > { %v416_v4 = vld [vmem:[%s1618_s21] sm:$0xff]  ;;  %v425_v7 = vld [vmem:[%s1618_s21 + $0x48] sm:$0xff]  ;;  %608 = vmatpush.bf16.msra.mxu1 %v1003_v1  ;;  %1055 = vmatpush.bf16.msra.mxu3 %v1003_v1  ;;  %v418_v16 = vld [vmem:[%s1618_s21 + $0x10] sm:$0xff]  ;;  %s1880_s4 = sld [smem:[#allocation20_spill]]  ;;  %s1004_s23 = sshll.u32 %s1420_s27, 4 }
  0x49   : > { %v424_v6 = vld [vmem:[%s1618_s21 + $0x40] sm:$0xff]  ;;  %v433_v9 = vld [vmem:[%s1625_s17 + $0x8] sm:$0xff]  ;;  %v448_v12 = vpack.c.bf16 %v417_v5, %v416_v4  ;;  %v419_v17 = vld [vmem:[%s1618_s21 + $0x18] sm:$0xff]  ;;  %s1881_s13 = sld [smem:[#allocation28_spill]]  ;;  %s737_s7 = sshll.u32 %s1709_s15, 4  ;;  %s1777_s7 = int_to_ptr.vmem [resolvable:$true] %s737_s7 }
  0x4a   : > { %v432_v8 = vld [vmem:[%s1625_s17] sm:$0xff]  ;;  %v441_v11 = vld [vmem:[%s1625_s17 + $0x48] sm:$0xff]  ;;  %v452_v13 = vpack.c.bf16 %v425_v7, %v424_v6  ;;  %v426_v18 = vld [vmem:[%s1618_s21 + $0x50] sm:$0xff]  ;;  %v449_v24 = vpack.c.bf16 %v419_v17, %v418_v16  ;;  %s1882_s16 = sld [smem:[#allocation29_spill]]  ;;  %s757_s2 = sshll.u32 %s1699_s19, 4  ;;  %s1786_s2 = int_to_ptr.vmem [resolvable:$true] %s757_s2 }
  0x4b   : > { %v440_v10 = vld [vmem:[%s1625_s17 + $0x40] sm:$0xff]  ;;  %516 = vmatpush.bf16.msra.mxu0 %v1000_v2  ;;  %1054 = vmatpush.bf16.msra.mxu2 %v1000_v2  ;;  %v456_v14 = vpack.c.bf16 %v433_v9, %v432_v8  ;;  %v427_v19 = vld [vmem:[%s1618_s21 + $0x58] sm:$0xff]  ;;  %v434_v20 = vld [vmem:[%s1625_s17 + $0x10] sm:$0xff]  ;;  %s717_s14 = scalar_lea.sflag [#allocation4], %s1614_s28 }
  0x4c   : > { %v460_v15 = vpack.c.bf16 %v441_v11, %v440_v10  ;;  %609 = vmatpush.bf16.msra.mxu1 %v1002_v3  ;;  %1056 = vmatpush.bf16.msra.mxu3 %v1002_v3  ;;  %v435_v21 = vld [vmem:[%s1625_s17 + $0x18] sm:$0xff]  ;;  %v442_v22 = vld [vmem:[%s1625_s17 + $0x50] sm:$0xff]  ;;  %v453_v25 = vpack.c.bf16 %v427_v19, %v426_v18  ;;  %v420_v28 = vld [vmem:[%s1618_s21 + $0x20] sm:$0xff] }
  0x4d   : > { %v443_v23 = vld [vmem:[%s1625_s17 + $0x58] sm:$0xff]  ;;  %v457_v26 = vpack.c.bf16 %v435_v21, %v434_v20  ;;  %v421_v29 = vld [vmem:[%s1618_s21 + $0x28] sm:$0xff]  ;;  %v428_v30 = vld [vmem:[%s1618_s21 + $0x60] sm:$0xff] }
  0x4e   : > { %962 = vmatmul.msk.bf16.vlgmr.msra.gmra.mxu0 %vm484_vm0, %v448_v12  ;;  %966 = vmatmul.msk.bf16.vlgmr.msra.gmra.mxu2 %vm484_vm0, %v452_v13  ;;  %v461_v27 = vpack.c.bf16 %v443_v23, %v442_v22  ;;  %v429_v31 = vld [vmem:[%s1618_s21 + $0x68] sm:$0xff]  ;;  %v436_v32 = vld [vmem:[%s1625_s17 + $0x20] sm:$0xff]  ;;  %v450_v36 = vpack.c.bf16 %v421_v29, %v420_v28  ;;  %v422_v40 = vld [vmem:[%s1618_s21 + $0x30] sm:$0xff]  ;;  %s990_s6 = sshll.u32 %s1880_s4, 5 }
  0x4f   : > { %978 = vmatmul.msk.bf16.vlgmr.msra.gmra.mxu1 %vm484_vm0, %v456_v14  ;;  %982 = vmatmul.msk.bf16.vlgmr.msra.gmra.mxu3 %vm484_vm0, %v460_v15  ;;  %v437_v33 = vld [vmem:[%s1625_s17 + $0x28] sm:$0xff]  ;;  %v444_v34 = vld [vmem:[%s1625_s17 + $0x60] sm:$0xff]  ;;  %v454_v37 = vpack.c.bf16 %v429_v31, %v428_v30  ;;  %v423_v41 = vld [vmem:[%s1618_s21 + $0x38] sm:$0xff]  ;;  %s734_s20 = sadd.s32 %s1004_s23, %s990_s6 }
  0x50   : > { %v445_v35 = vld [vmem:[%s1625_s17 + $0x68] sm:$0xff]  ;;  %v458_v38 = vpack.c.bf16 %v437_v33, %v436_v32  ;;  %v430_v42 = vld [vmem:[%s1618_s21 + $0x70] sm:$0xff]  ;;  %v431_v43 = vld [vmem:[%s1618_s21 + $0x78] sm:$0xff]  ;;  %v451_v48 = vpack.c.bf16 %v423_v41, %v422_v40  ;;  %s991_s18 = sshll.u32 %s734_s20, 2 }
  0x51   : > { %v462_v39 = vpack.c.bf16 %v445_v35, %v444_v34  ;;  %v438_v44 = vld [vmem:[%s1625_s17 + $0x30] sm:$0xff]  ;;  %v439_v45 = vld [vmem:[%s1625_s17 + $0x38] sm:$0xff]  ;;  %v455_v49 = vpack.c.bf16 %v431_v43, %v430_v42  ;;  %v1690_v52 = vld [vmem:[%s1849_s5] ss:$0 sm:$0xff]  ;;  %s736_s12 = scalar_lea.hbm %s1881_s13, %s991_s18 }
  0x52   : > { %v446_v46 = vld [vmem:[%s1625_s17 + $0x70] sm:$0xff]  ;;  %v447_v47 = vld [vmem:[%s1625_s17 + $0x78] sm:$0xff]  ;;  %v459_v50 = vpack.c.bf16 %v439_v45, %v438_v44  ;;  %v1697_v57 = vld [vmem:[%s1847_s3] ss:$0 sm:$0xff]  ;;  %s756_s17 = scalar_lea.hbm %s1882_s16, %s991_s18  ;;  %s739_s9 = sshll.u32 %s736_s12, 4  ;;  %s740_s9 = int_to_ptr.hbm [resolvable:$true] %s739_s9 }
  0x53   : > { %v463_v51 = vpack.c.bf16 %v447_v47, %v446_v46  ;;  %s759_s22 = sshll.u32 %s756_s17, 4  ;;  %s1308_s4 = sshra.s32 %s740_s9, 4  ;;  %s1783_s22 = int_to_ptr.hbm [resolvable:$true] %s759_s22  ;;  %s1309_s4 = int_to_ptr.hbm [resolvable:$true] %s1308_s4 }
  0x54   : > { %s1310_s23 = scalar_lea.hbm %s1309_s4, 64  ;;  %s1314_s18 = scalar_lea.hbm %s1881_s13, 256 }
  0x55   : > { %p1311_p1 = scmp.ne.s32.totalorder %s1309_s4, %s1310_s23  ;;  %p1315_p10 = scmp.lt.s32.totalorder %s1309_s4, %s1881_s13 }
  0x56   : > { %p1316_p11 = scmp.lt.s32.totalorder %s1314_s18, %s1310_s23 }
  0x57   : > { %p1312_p4 = pnand %p1311_p1, %p1577_p5 }
  0x58   : > { %p1317_p12 = por %p1316_p11, %p1315_p10 }
  0x59   : > { %p1313_p8 = pneg %p1312_p4 }
  0x5b   : > { %p1318_p13 = pnand %p1317_p12, %p1313_p8 }
  0x5e   : > { %963 = vmatmul.msk.bf16.gmra.mxu0 %vm484_vm0, %v449_v24  ;;  %967 = vmatmul.msk.bf16.gmra.mxu2 %vm484_vm0, %v453_v25 }
  0x5f   : > { %979 = vmatmul.msk.bf16.gmra.mxu1 %vm484_vm0, %v457_v26  ;;  %983 = vmatmul.msk.bf16.gmra.mxu3 %vm484_vm0, %v461_v27 }
  0x6e   : > { %964 = vmatmul.msk.bf16.gmra.mxu0 %vm484_vm0, %v450_v36  ;;  %968 = vmatmul.msk.bf16.gmra.mxu2 %vm484_vm0, %v454_v37 }
  0x6f   : > { %980 = vmatmul.msk.bf16.gmra.mxu1 %vm484_vm0, %v458_v38  ;;  %984 = vmatmul.msk.bf16.gmra.mxu3 %vm484_vm0, %v462_v39 }
  0x7e   : > { %965 = vmatmul.msk.bf16.gmra.mxu0 %vm484_vm0, %v451_v48  ;;  %969 = vmatmul.msk.bf16.gmra.mxu2 %vm484_vm0, %v455_v49 }
  0x7f   : > { %981 = vmatmul.msk.bf16.gmra.mxu1 %vm484_vm0, %v459_v50  ;;  %985 = vmatmul.msk.bf16.gmra.mxu3 %vm484_vm0, %v463_v51 }
  0xcb   : > { %v518_v53 = vpop.f32.mrf.mxu0 }
  0xcc   : > { %v611_v54 = vpop.f32.mrf.mxu1  ;;  %v519_v62 = vadd.f32 %v1697_v57, %v518_v53 }
  0xcd   : > { %v612_v55 = vadd.f32 %v1690_v52, %v611_v54 }
  0xcf   : > { %v683_v56 = vpack.c.bf16 %v612_v55, %v612_v55 }
  0xd1   : > { %700 = vst.msk [vmem:[%s1699_s19] sm:$0xf] %vm699_vm1, %v683_v56  ;;  %v538_v58 = vpop.f32.mrf.mxu2 }
  0xd2   : > { %v631_v59 = vpop.f32.mrf.mxu3  ;;  %v539_v6 = vadd.f32 %v1697_v57, %v538_v58 }
  0xd3   : > { %v632_v60 = vadd.f32 %v1690_v52, %v631_v59  ;;  %v520_v61 = vpop.f32.mrf.mxu0 }
  0xd4   : > { %v521_v63 = vadd.f32 %v1697_v57, %v520_v61  ;;  %v613_v0 = vpop.f32.mrf.mxu1 }
  0xd5   : > { %v691_v1 = vpack.c.bf16 %v632_v60, %v632_v60  ;;  %v614_v2 = vadd.f32 %v1690_v52, %v613_v0 }
  0xd6   : > { %v1009_v3 = vpack.c.bf16 %v521_v63, %v519_v62 }
  0xd7   : > { %708 = vst.msk [vmem:[%s1699_s19 + $0x20] sm:$0xf] %vm699_vm1, %v691_v1  ;;  %v684_v4 = vpack.c.bf16 %v614_v2, %v614_v2 }
  0xd8   : > { %1010 = vst [vmem:[%s1709_s15] sm:$0xff] %v1009_v3  }
  0xd9   : > { %701 = vst.msk [vmem:[%s1699_s19 + $0x4] sm:$0xf] %vm699_vm1, %v684_v4  ;;  %v540_v5 = vpop.f32.mrf.mxu2 }
  0xda   : > { %v541_v7 = vadd.f32 %v1697_v57, %v540_v5  ;;  %v633_v8 = vpop.f32.mrf.mxu3 }
  0xdb   : > { %v634_v9 = vadd.f32 %v1690_v52, %v633_v8  ;;  %v523_v10 = vpop.f32.mrf.mxu0 }
  0xdc   : > { %v1029_v11 = vpack.c.bf16 %v541_v7, %v539_v6  ;;  %v616_v12 = vpop.f32.mrf.mxu1  ;;  %v524_v20 = vadd.f32 %v1697_v57, %v523_v10 }
  0xdd   : > { %v692_v13 = vpack.c.bf16 %v634_v9, %v634_v9  ;;  %v617_v14 = vadd.f32 %v1690_v52, %v616_v12 }
  0xde   : > { %1049 = vst [vmem:[%s1709_s15 + $0x20] sm:$0xff] %v1029_v11  }
  0xdf   : > { %709 = vst.msk [vmem:[%s1699_s19 + $0x24] sm:$0xf] %vm699_vm1, %v692_v13  ;;  %v685_v15 = vpack.c.bf16 %v617_v14, %v617_v14 }
  0xe1   : > { %702 = vst.msk [vmem:[%s1699_s19 + $0x8] sm:$0xf] %vm699_vm1, %v685_v15  ;;  %v543_v16 = vpop.f32.mrf.mxu2 }
  0xe2   : > { %v636_v17 = vpop.f32.mrf.mxu3  ;;  %v544_v28 = vadd.f32 %v1697_v57, %v543_v16 }
  0xe3   : > { %v637_v18 = vadd.f32 %v1690_v52, %v636_v17  ;;  %v525_v19 = vpop.f32.mrf.mxu0 }
  0xe4   : > { %v526_v21 = vadd.f32 %v1697_v57, %v525_v19  ;;  %v618_v22 = vpop.f32.mrf.mxu1 }
  0xe5   : > { %v693_v23 = vpack.c.bf16 %v637_v18, %v637_v18  ;;  %v619_v24 = vadd.f32 %v1690_v52, %v618_v22 }
  0xe6   : > { %v1014_v25 = vpack.c.bf16 %v526_v21, %v524_v20 }
  0xe7   : > { %710 = vst.msk [vmem:[%s1699_s19 + $0x28] sm:$0xf] %vm699_vm1, %v693_v23  ;;  %v686_v26 = vpack.c.bf16 %v619_v24, %v619_v24 }
  0xe8   : > { %1046 = vst [vmem:[%s1709_s15 + $0x8] sm:$0xff] %v1014_v25  }
  0xe9   : > { %703 = vst.msk [vmem:[%s1699_s19 + $0xc] sm:$0xf] %vm699_vm1, %v686_v26  ;;  %v545_v27 = vpop.f32.mrf.mxu2 }
  0xea   : > { %v546_v29 = vadd.f32 %v1697_v57, %v545_v27  ;;  %v638_v30 = vpop.f32.mrf.mxu3 }
  0xeb   : > { %v639_v31 = vadd.f32 %v1690_v52, %v638_v30  ;;  %v528_v32 = vpop.f32.mrf.mxu0 }
  0xec   : > { %v1034_v33 = vpack.c.bf16 %v546_v29, %v544_v28  ;;  %v621_v34 = vpop.f32.mrf.mxu1  ;;  %v529_v42 = vadd.f32 %v1697_v57, %v528_v32 }
  0xed   : > { %v694_v35 = vpack.c.bf16 %v639_v31, %v639_v31  ;;  %v622_v36 = vadd.f32 %v1690_v52, %v621_v34 }
  0xee   : > { %1050 = vst [vmem:[%s1709_s15 + $0x28] sm:$0xff] %v1034_v33  }
  0xef   : > { %711 = vst.msk [vmem:[%s1699_s19 + $0x2c] sm:$0xf] %vm699_vm1, %v694_v35  ;;  %v687_v37 = vpack.c.bf16 %v622_v36, %v622_v36 }
  0xf1   : > { %704 = vst.msk [vmem:[%s1699_s19 + $0x10] sm:$0xf] %vm699_vm1, %v687_v37  ;;  %v548_v38 = vpop.f32.mrf.mxu2 }
  0xf2   : > { %v641_v39 = vpop.f32.mrf.mxu3  ;;  %v549_v50 = vadd.f32 %v1697_v57, %v548_v38 }
  0xf3   : > { %v642_v40 = vadd.f32 %v1690_v52, %v641_v39  ;;  %v530_v41 = vpop.f32.mrf.mxu0 }
  0xf4   : > { %v531_v43 = vadd.f32 %v1697_v57, %v530_v41  ;;  %v623_v44 = vpop.f32.mrf.mxu1 }
  0xf5   : > { %v695_v45 = vpack.c.bf16 %v642_v40, %v642_v40  ;;  %v624_v46 = vadd.f32 %v1690_v52, %v623_v44 }
  0xf6   : > { %v1019_v47 = vpack.c.bf16 %v531_v43, %v529_v42 }
  0xf7   : > { %712 = vst.msk [vmem:[%s1699_s19 + $0x30] sm:$0xf] %vm699_vm1, %v695_v45  ;;  %v688_v48 = vpack.c.bf16 %v624_v46, %v624_v46 }
  0xf8   : > { %1047 = vst [vmem:[%s1709_s15 + $0x10] sm:$0xff] %v1019_v47  }
  0xf9   : > { %705 = vst.msk [vmem:[%s1699_s19 + $0x14] sm:$0xf] %vm699_vm1, %v688_v48  ;;  %v550_v49 = vpop.f32.mrf.mxu2 }
  0xfa   : > { %v551_v51 = vadd.f32 %v1697_v57, %v550_v49  ;;  %v643_v53 = vpop.f32.mrf.mxu3 }
  0xfb   : > { %v644_v54 = vadd.f32 %v1690_v52, %v643_v53  ;;  %v533_v55 = vpop.f32.mrf.mxu0 }
  0xfc   : > { %v1039_v56 = vpack.c.bf16 %v551_v51, %v549_v50  ;;  %v626_v58 = vpop.f32.mrf.mxu1  ;;  %v534_v2 = vadd.f32 %v1697_v57, %v533_v55 }
  0xfd   : > { %v696_v59 = vpack.c.bf16 %v644_v54, %v644_v54  ;;  %v627_v60 = vadd.f32 %v1690_v52, %v626_v58 }
  0xfe   : > { %1051 = vst [vmem:[%s1709_s15 + $0x30] sm:$0xff] %v1039_v56  }
  0xff   : > { %713 = vst.msk [vmem:[%s1699_s19 + $0x34] sm:$0xf] %vm699_vm1, %v696_v59  ;;  %v689_v61 = vpack.c.bf16 %v627_v60, %v627_v60 }
 0x101   : > { %706 = vst.msk [vmem:[%s1699_s19 + $0x18] sm:$0xf] %vm699_vm1, %v689_v61  ;;  %v553_v62 = vpop.f32.mrf.mxu2 }
 0x102   : > { %v646_v63 = vpop.f32.mrf.mxu3  ;;  %v554_v10 = vadd.f32 %v1697_v57, %v553_v62 }
 0x103   : > { %v647_v0 = vadd.f32 %v1690_v52, %v646_v63  ;;  %v535_v1 = vpop.f32.mrf.mxu0 }
 0x104   : > { %v536_v3 = vadd.f32 %v1697_v57, %v535_v1  ;;  %v628_v4 = vpop.f32.mrf.mxu1 }
 0x105   : > { %v697_v5 = vpack.c.bf16 %v647_v0, %v647_v0  ;;  %v629_v6 = vadd.f32 %v1690_v52, %v628_v4 }
 0x106   : > { %v1024_v7 = vpack.c.bf16 %v536_v3, %v534_v2 }
 0x107   : > { %714 = vst.msk [vmem:[%s1699_s19 + $0x38] sm:$0xf] %vm699_vm1, %v697_v5  ;;  %v690_v8 = vpack.c.bf16 %v629_v6, %v629_v6 }
 0x108   : > { %1048 = vst [vmem:[%s1709_s15 + $0x18] sm:$0xff] %v1024_v7  }
 0x109   : > { %707 = vst.msk [vmem:[%s1699_s19 + $0x1c] sm:$0xf] %vm699_vm1, %v690_v8  ;;  %v555_v9 = vpop.f32.mrf.mxu2 }
 0x10a   : > { %v556_v11 = vadd.f32 %v1697_v57, %v555_v9  ;;  %v648_v12 = vpop.f32.mrf.mxu3 }
 0x10b   : > { %v649_v13 = vadd.f32 %v1690_v52, %v648_v12 }
 0x10c   : > { %v1044_v14 = vpack.c.bf16 %v556_v11, %v554_v10 }
 0x10d   : > { %v698_v15 = vpack.c.bf16 %v649_v13, %v649_v13 }
 0x10e   : > { %1052 = vst [vmem:[%s1709_s15 + $0x38] sm:$0xff] %v1044_v14  }
 0x10f   : > { %715 = vst.msk [vmem:[%s1699_s19 + $0x3c] sm:$0xf] %vm699_vm1, %v698_v15 }
 0x110   : > { %1321 = shalt.err (!%p1318_p13)
}
 0x111   : > { %s1444_s19 = smov 64   ;;  %s1445_s15 = smov 4  }
 0x112   : > { %1069 = dma.vmem_to_hbm [thread:$0]  (%p1577_p5), %s1777_s7, 1024, %s740_s9, %s717_s14, %s1444_s19, %s1444_s19, %s1445_s15  }
 0x113   : > { %s722_s12 = scalar_lea.sflag [#allocation12], %s1614_s28  ;;  %s1336_s21 = sshra.s32 %s1783_s22, 4  ;;  %s1337_s21 = int_to_ptr.hbm [resolvable:$true] %s1336_s21 }
 0x114   : > { %s1338_s0 = scalar_lea.hbm %s1337_s21, 64  ;;  %s1342_s23 = scalar_lea.hbm %s1882_s16, 256 }
 0x115   : > { %p1339_p0 = scmp.ne.s32.totalorder %s1337_s21, %s1338_s0  ;;  %p1343_p9 = scmp.lt.s32.totalorder %s1337_s21, %s1882_s16 }
 0x116   : > { %p1344_p2 = scmp.lt.s32.totalorder %s1342_s23, %s1338_s0 }
 0x117   : > { %p1340_p3 = pnand %p1339_p0, %p1577_p5 }
 0x118   : > { %p1345_p1 = por %p1344_p2, %p1343_p9 }
 0x119   : > { %p1341_p7 = pneg %p1340_p3 }
 0x11b   : > { %p1346_p4 = pnand %p1345_p1, %p1341_p7 }
 0x11d   : > { %1349 = shalt.err (!%p1346_p4)
}
 0x11e   : > { %1070 = dma.vmem_to_hbm [thread:$0]  (%p1577_p5), %s1786_s2, 1024, %s1783_s22, %s722_s12, %s1444_s19, %s1444_s19, %s1445_s15  }
 0x11f PF: > { %s1884_s28 = sld [smem:[#allocation19_spill]]  ;;  %p1099_p8 = scmp.ge.s32.totalorder %s1436_s8, 2 }
 0x121   : > { %p1088_p10 = pnand %p1099_p8, %p1541_p6 }
 0x123   : > { %p1089_p11 = pneg %p1088_p10 }
 0x125   : > { %s774_s9 = sand.u32 1, %s1884_s28  }
 0x126   : > { %s775_s14 = scalar_lea.sflag [#allocation4], %s774_s9 }
 0x127   : > { %1399 = dma.done.wait (%p1089_p11), %s775_s14, 1024  }
 0x128   : > { %1401 = vsyncadd (%p1089_p11), %s775_s14, 4294966272  ;;  %s785_s18 = scalar_lea.sflag [#allocation12], %s774_s9 }
 0x129   : > { %1403 = dma.done.wait (%p1089_p11), %s785_s18, 1024  }
 0x12a   : > { %1405 = vsyncadd (%p1089_p11), %s785_s18, 4294966272  ;;  %s31_s8 = sadd.s32 1, %s1436_s8   ;;  %s1886_s11 = smov %s1590_s24 }
 0x12b   : > { %p28_p12 = scmp.ge.s32.totalorder %s31_s8, 6   ;;  %s1887_s22 = sld [smem:[#allocation22_spill]] }
 0x12c   : > { %s1888_s2 = sld [smem:[#allocation24_spill]]  ;;  %s1889_s24 = smov %s1412_s25 }
 0x12d   : > { %s1890_s25 = smov %s1416_s26  ;;  %s1891_s26 = smov %s1886_s11 }
 0x12e   : > { %s1892_s27 = smov %s1428_s29  ;;  %s1893_s28 = smov %s1432_s30 }
 0x12f   :  { %30 = sbr.rel (!%p28_p12) target bundleno = 18 (0x12), region = 127 }
 0x131   : > { %s1894_s29 = smov %s1887_s22 }
 0x132   : > { %s1895_s30 = smov %s1888_s2 }
 0x134   :  { %791 = vsyncpa [#allocation3], 1 }
 0x135   :  { %793 = vsyncpa [#allocation3 + $0x1], 1 }
 0x136   :  { %794 = vsyncpa [#allocation6], 1 }
 0x137   :  { %796 = vsyncpa [#allocation6 + $0x1], 1 }
 0x138   :  { %797 = vsyncpa [#allocation9], 1 }
 0x139   :  { %798 = vsyncpa [#allocation4], 1 }
 0x13a   :  { %800 = vsyncpa [#allocation4 + $0x1], 1 }
 0x13b   :  { %801 = vsyncpa [#allocation12], 1 }
 0x13c   :  { %803 = vsyncpa [#allocation12 + $0x1], 1 }

</bundles_post_ra>
